<compile_context>
chip_gen: v5e
topology: v5e:2x2
jax: 0.10.0
libtpu: 0.0.40
codegen_flags: <defaults>
</compile_context>

<pallas_src>
import functools

import jax
import jax.numpy as jnp
from jax import lax
from jax.experimental import pallas as pl
from jax.experimental.pallas import tpu as pltpu

BN_EPS = 1e-5


# --------------------------------------------------------------------------
# Kernels
# --------------------------------------------------------------------------
def _conv_stats_kernel(p_ref, w_ref, y_ref, stats_ref):
    """p_ref: [1, K, TL]  w_ref: [C, K]  y_ref: [1, C, TL]  stats_ref: [1, C, 2]."""
    @pl.when(pl.program_id(1) == 0)
    def _():
        stats_ref[...] = jnp.zeros_like(stats_ref)

    # Conv as matmul on the MXU; accumulate in f32 regardless of operand dtype.
    y = jnp.dot(w_ref[...], p_ref[0], preferred_element_type=jnp.float32)  # [C, TL]
    y_ref[0] = y.astype(y_ref.dtype)

    # Per-channel batch-stat partials (lane-axis reduce -> all 128 lanes active).
    stats_ref[0, :, 0:1] += jnp.sum(y, axis=1, keepdims=True)
    stats_ref[0, :, 1:2] += jnp.sum(y * y, axis=1, keepdims=True)


def _bn_relu_kernel(y_ref, scale_ref, shift_ref, o_ref):
    """y_ref: [1, C, TL]  scale/shift: [C, 1]  o_ref: [1, C, TL]."""
    z = y_ref[0] * scale_ref[...] + shift_ref[...]
    o_ref[0] = jnp.maximum(z, 0.0).astype(o_ref.dtype)


# --------------------------------------------------------------------------
# Wrapper
# --------------------------------------------------------------------------
def _pick_lane_tile(howo, max_tile=2048):
    """Largest multiple-of-128 divisor of howo (<= max_tile), else the full extent."""
    if howo % 128 == 0:
        t = min(howo, max_tile)
        t -= t % 128
        while t >= 128:
            if howo % t == 0:
                return t
            t -= 128
    return howo


def _im2col_per_image(x, kh, kw, stride, pad):
    """x [N,C,H,W] -> patches [N, C*kh*kw, Ho*Wo]; K ordered (C_in, kh, kw), kw fastest."""
    # TODO(synk): fold im2col into the kernel (strided in-VMEM gather from a haloed
    # input row-tile) to cut HBM read traffic ~kh*kw/stride^2 and drop this pass.
    n, c, h, w = x.shape
    xp = jnp.pad(x, ((0, 0), (0, 0), (pad, pad), (pad, pad)))
    ho = (h + 2 * pad - kh) // stride + 1
    wo = (w + 2 * pad - kw) // stride + 1
    cols = []
    for i in range(kh):
        for j in range(kw):
            cols.append(xp[:, :, i:i + stride * ho:stride, j:j + stride * wo:stride])
    cols = jnp.stack(cols, axis=2)                      # [N, C, kh*kw, Ho, Wo]
    return cols.reshape(n, c * kh * kw, ho * wo), ho, wo


@functools.partial(jax.jit, static_argnames=("stride", "padding", "matmul_dtype"))
def conv_block_forward(x, weight, bias, gamma, beta, *, stride=2, padding=1,
                       matmul_dtype=jnp.float32):
    """x: [N, C_in, H, W] f32. weight: [C_out, C_in, kh, kw]. Returns NCHW f32."""
    del bias  # Per-channel conv bias cancels exactly under training-mode BatchNorm.
    n, c_in, h, w = x.shape
    c_out, _, kh, kw = weight.shape
    patches, ho, wo = _im2col_per_image(x, kh, kw, stride, padding)  # [N, K, HoWo]
    k = c_in * kh * kw
    howo = ho * wo
    m_total = n * howo

    tl = _pick_lane_tile(howo)          # lane-tile over the spatial axis
    s_blocks = howo // tl
    grid = (n, s_blocks)

    # Optionally cast streaming matmul operands (e.g. bf16) — accumulation stays
    # f32 via preferred_element_type; default f32 to keep exact module semantics.
    patches_c = patches.astype(matmul_dtype)
    w_ck = weight.reshape(c_out, k).astype(matmul_dtype)   # [C_out, K]

    itemsize = jnp.dtype(matmul_dtype).itemsize
    cost1 = pl.CostEstimate(
        flops=2 * m_total * k * c_out,
        transcendentals=0,
        bytes_accessed=(m_total * k * itemsize + c_out * k * itemsize
                        + m_total * c_out * 4 + n * c_out * 2 * 4),
    )

    # Pass 1: conv (MXU) + per-image per-channel sum / sum-of-squares.
    y, stats = pl.pallas_call(
        _conv_stats_kernel,
        out_shape=(
            jax.ShapeDtypeStruct((n, c_out, howo), jnp.float32),   # conv result
            jax.ShapeDtypeStruct((n, c_out, 2), jnp.float32),      # [sum, sumsq]
        ),
        grid=grid,
        in_specs=[
            pl.BlockSpec((1, k, tl), lambda ni, si: (ni, 0, si)),
            pl.BlockSpec((c_out, k), lambda ni, si: (0, 0)),
        ],
        out_specs=(
            pl.BlockSpec((1, c_out, tl), lambda ni, si: (ni, 0, si)),
            pl.BlockSpec((1, c_out, 2), lambda ni, si: (ni, 0, 0)),  # resident acc over si
        ),
        compiler_params=pltpu.CompilerParams(
            dimension_semantics=("parallel", "arbitrary"),
            vmem_limit_bytes=32 * 1024 * 1024,
        ),
        cost_estimate=cost1,
    )(patches_c, w_ck)

    # Fold BN into per-channel scale/shift (tiny ops, fused by XLA).
    stats_tot = jnp.sum(stats, axis=0)                   # [C, 2]
    mean = stats_tot[:, 0] / m_total
    var = jnp.maximum(stats_tot[:, 1] / m_total - mean * mean, 0.0)
    inv_std = lax.rsqrt(var + BN_EPS)
    scale = (gamma * inv_std).reshape(c_out, 1).astype(jnp.float32)
    shift = (beta - mean * gamma * inv_std).reshape(c_out, 1).astype(jnp.float32)

    cost2 = pl.CostEstimate(
        flops=3 * m_total * c_out,
        transcendentals=0,
        bytes_accessed=2 * m_total * c_out * 4,
    )

    # Pass 2: normalize + affine + ReLU, in-place over y.
    out = pl.pallas_call(
        _bn_relu_kernel,
        out_shape=jax.ShapeDtypeStruct((n, c_out, howo), jnp.float32),
        grid=grid,
        in_specs=[
            pl.BlockSpec((1, c_out, tl), lambda ni, si: (ni, 0, si)),
            pl.BlockSpec((c_out, 1), lambda ni, si: (0, 0)),
            pl.BlockSpec((c_out, 1), lambda ni, si: (0, 0)),
        ],
        out_specs=pl.BlockSpec((1, c_out, tl), lambda ni, si: (ni, 0, si)),
        input_output_aliases={0: 0},
        compiler_params=pltpu.CompilerParams(
            dimension_semantics=("parallel", "parallel"),
            vmem_limit_bytes=32 * 1024 * 1024,
        ),
        cost_estimate=cost2,
    )(y, scale, shift)

    # [N, C_out, Ho*Wo] is already NCHW flattened over spatial: reshape only, no transpose.
    return out.reshape(n, c_out, ho, wo)


# --------------------------------------------------------------------------
# Pure-JAX reference (lax.conv + training-mode BN + ReLU), for checking.
# --------------------------------------------------------------------------
def reference_forward(x, weight, bias, gamma, beta, *, stride=2, padding=1):
    y = lax.conv_general_dilated(
        x, weight,
        window_strides=(stride, stride),
        padding=[(padding, padding), (padding, padding)],
        dimension_numbers=("NCHW", "OIHW", "NCHW"),
    ) + bias.reshape(1, -1, 1, 1)
    mean = jnp.mean(y, axis=(0, 2, 3), keepdims=True)
    var = jnp.mean((y - mean) ** 2, axis=(0, 2, 3), keepdims=True)
    z = (y - mean) * lax.rsqrt(var + BN_EPS)
    z = z * gamma.reshape(1, -1, 1, 1) + beta.reshape(1, -1, 1, 1)
    return jnp.maximum(z, 0.0)


if __name__ == "__main__":
    N, C_IN, H, W = 2, 4, 16, 16
    C_OUT, KH, KW = 8, 3, 3
    STRIDE, PAD = 2, 1

    key = jax.random.PRNGKey(0)
    kx, kw_, kb, kg, kbe = jax.random.split(key, 5)

    x = jax.random.normal(kx, (N, C_IN, H, W), dtype=jnp.float32)
    weight = 0.1 * jax.random.normal(kw_, (C_OUT, C_IN, KH, KW), dtype=jnp.float32)
    bias = 0.1 * jax.random.normal(kb, (C_OUT,), dtype=jnp.float32)
    gamma = 1.0 + 0.1 * jax.random.normal(kg, (C_OUT,), dtype=jnp.float32)
    beta = 0.1 * jax.random.normal(kbe, (C_OUT,), dtype=jnp.float32)

    out = conv_block_forward(x, weight, bias, gamma, beta, stride=STRIDE, padding=PAD)
    out = jax.block_until_ready(out)

    ref = reference_forward(x, weight, bias, gamma, beta, stride=STRIDE, padding=PAD)
    assert out.shape == (N, C_OUT, H // 2, W // 2), out.shape
    assert bool(jnp.allclose(out, ref, atol=1e-3, rtol=1e-3)), "mismatch vs reference"

    print("KERNEL_OK")
</pallas_src>

<mosaic_0001>
module attributes {stable_mosaic.version = 11 : i64} {
  func.func @_conv_stats_kernel(%arg0: i32, %arg1: i32, %arg2: memref<1x36x64xf32, #tpu.memory_space<vmem>>, %arg3: memref<8x36xf32, #tpu.memory_space<vmem>>, %arg4: memref<1x8x64xf32, #tpu.memory_space<vmem>>, %arg5: memref<1x8x2xf32, #tpu.memory_space<vmem>>) attributes {dimension_semantics = [#tpu.dimension_semantics<parallel>, #tpu.dimension_semantics<arbitrary>], iteration_bounds = array<i64: 2, 1>, scalar_prefetch = 0 : i64, scratch_operands = 0 : i64, tpu.core_type = #tpu.core_type<tc>, window_params = [{transform_indices = @transform_0, window_bounds = array<i64: 1, 36, 64>}, {pipeline_mode = #tpu.pipeline_mode<synchronous>, transform_indices = @transform_1, window_bounds = array<i64: 8, 36>}, {transform_indices = @transform_2, window_bounds = array<i64: 1, 8, 64>}, {transform_indices = @transform_3, window_bounds = array<i64: 1, 8, 2>}]} {
    %c0_i32 = arith.constant 0 : i32
    %0 = arith.cmpi eq, %arg1, %c0_i32 : i32
    %1 = arith.extui %0 : i1 to i32
    %c0_i32_0 = arith.constant 0 : i32
    %2 = arith.cmpi ne, %1, %c0_i32_0 : i32
    scf.if %2 {
      %cst_21 = arith.constant 0.000000e+00 : f32
      %27 = vector.broadcast %cst_21 : f32 to vector<1x8x2xf32>
      %c0_22 = arith.constant 0 : index
      %c0_23 = arith.constant 0 : index
      %c0_24 = arith.constant 0 : index
      %28 = vector.load %arg5[%c0_22, %c0_23, %c0_24] : memref<1x8x2xf32, #tpu.memory_space<vmem>>, vector<1x8x2xf32>
      tpu.vector_store %arg5[%c0_22, %c0_23, %c0_24], %27 {strides = array<i32>} : memref<1x8x2xf32, #tpu.memory_space<vmem>>, vector<1x8x2xf32>,
    } else {
    }
    %c0 = arith.constant 0 : index
    %c0_1 = arith.constant 0 : index
    %3 = vector.load %arg3[%c0, %c0_1] : memref<8x36xf32, #tpu.memory_space<vmem>>, vector<8x36xf32>
    %c0_2 = arith.constant 0 : index
    %c0_3 = arith.constant 0 : index
    %c0_4 = arith.constant 0 : index
    %4 = vector.load %arg2[%c0_2, %c0_3, %c0_4] : memref<1x36x64xf32, #tpu.memory_space<vmem>>, vector<1x36x64xf32>
    %5 = vector.shape_cast %4 : vector<1x36x64xf32> to vector<36x64xf32>
    %cst = arith.constant dense<0.000000e+00> : vector<8x64xf32>
    %6 = tpu.matmul %3, %5, %cst {dimension_numbers = #tpu.dot_dimension_numbers<[1], [0], [0], [1], [0, 0, 1, 1], [], []>} : vector<8x36xf32>, vector<36x64xf32>, vector<8x64xf32> -> vector<8x64xf32>
    %c0_5 = arith.constant 0 : index
    %c0_6 = arith.constant 0 : index
    %c0_7 = arith.constant 0 : index
    %7 = vector.load %arg4[%c0_5, %c0_6, %c0_7] : memref<1x8x64xf32, #tpu.memory_space<vmem>>, vector<1x8x64xf32>
    %8 = vector.shape_cast %7 : vector<1x8x64xf32> to vector<8x64xf32>
    %9 = vector.shape_cast %6 : vector<8x64xf32> to vector<1x8x64xf32>
    tpu.vector_store %arg4[%c0_5, %c0_6, %c0_7], %9 {strides = array<i32>} : memref<1x8x64xf32, #tpu.memory_space<vmem>>, vector<1x8x64xf32>,
    %c0_8 = arith.constant 0 : index
    %c0_9 = arith.constant 0 : index
    %c0_10 = arith.constant 0 : index
    %10 = vector.load %arg5[%c0_8, %c0_9, %c0_10] : memref<1x8x2xf32, #tpu.memory_space<vmem>>, vector<1x8x1xf32>
    %11 = vector.shape_cast %10 : vector<1x8x1xf32> to vector<8x1xf32>
    %cst_11 = arith.constant dense<0.000000e+00> : vector<8xf32>
    %12 = vector.multi_reduction <add>, %6, %cst_11 [1] : vector<8x64xf32> to vector<8xf32>
    %13 = vector.shape_cast %12 : vector<8xf32> to vector<8x1xf32>
    %14 = arith.addf %11, %13 : vector<8x1xf32>
    %c0_12 = arith.constant 0 : index
    %c0_13 = arith.constant 0 : index
    %c0_14 = arith.constant 0 : index
    %15 = vector.load %arg5[%c0_12, %c0_13, %c0_14] : memref<1x8x2xf32, #tpu.memory_space<vmem>>, vector<1x8x1xf32>
    %16 = vector.shape_cast %15 : vector<1x8x1xf32> to vector<8x1xf32>
    %17 = vector.shape_cast %14 : vector<8x1xf32> to vector<1x8x1xf32>
    tpu.vector_store %arg5[%c0_12, %c0_13, %c0_14], %17 {strides = array<i32>} : memref<1x8x2xf32, #tpu.memory_space<vmem>>, vector<1x8x1xf32>,
    %c0_15 = arith.constant 0 : index
    %c0_16 = arith.constant 0 : index
    %c1 = arith.constant 1 : index
    %18 = vector.load %arg5[%c0_15, %c0_16, %c1] : memref<1x8x2xf32, #tpu.memory_space<vmem>>, vector<1x8x1xf32>
    %19 = vector.shape_cast %18 : vector<1x8x1xf32> to vector<8x1xf32>
    %20 = arith.mulf %6, %6 : vector<8x64xf32>
    %cst_17 = arith.constant dense<0.000000e+00> : vector<8xf32>
    %21 = vector.multi_reduction <add>, %20, %cst_17 [1] : vector<8x64xf32> to vector<8xf32>
    %22 = vector.shape_cast %21 : vector<8xf32> to vector<8x1xf32>
    %23 = arith.addf %19, %22 : vector<8x1xf32>
    %c0_18 = arith.constant 0 : index
    %c0_19 = arith.constant 0 : index
    %c1_20 = arith.constant 1 : index
    %24 = vector.load %arg5[%c0_18, %c0_19, %c1_20] : memref<1x8x2xf32, #tpu.memory_space<vmem>>, vector<1x8x1xf32>
    %25 = vector.shape_cast %24 : vector<1x8x1xf32> to vector<8x1xf32>
    %26 = vector.shape_cast %23 : vector<8x1xf32> to vector<1x8x1xf32>
    tpu.vector_store %arg5[%c0_18, %c0_19, %c1_20], %26 {strides = array<i32>} : memref<1x8x2xf32, #tpu.memory_space<vmem>>, vector<1x8x1xf32>,
    return
  }
  func.func @transform_0(%arg0: i32, %arg1: i32) -> (i32, i32, i32) {
    %c0_i32 = arith.constant 0 : i32
    %c0_i32_0 = arith.constant 0 : i32
    return %arg0, %c0_i32, %arg1 : i32, i32, i32
  }
  func.func @transform_1(%arg0: i32, %arg1: i32) -> (i32, i32) {
    %c0_i32 = arith.constant 0 : i32
    %c0_i32_0 = arith.constant 0 : i32
    %c0_i32_1 = arith.constant 0 : i32
    return %c0_i32, %c0_i32_0 : i32, i32
  }
  func.func @transform_2(%arg0: i32, %arg1: i32) -> (i32, i32, i32) {
    %c0_i32 = arith.constant 0 : i32
    %c0_i32_0 = arith.constant 0 : i32
    return %arg0, %c0_i32, %arg1 : i32, i32, i32
  }
  func.func @transform_3(%arg0: i32, %arg1: i32) -> (i32, i32, i32) {
    %c0_i32 = arith.constant 0 : i32
    %c0_i32_0 = arith.constant 0 : i32
    %c0_i32_1 = arith.constant 0 : i32
    return %arg0, %c0_i32, %c0_i32_0 : i32, i32, i32
  }
}

module attributes {stable_mosaic.version = 11 : i64} {
  func.func @_bn_relu_kernel(%arg0: i32, %arg1: i32, %arg2: memref<1x8x64xf32, #tpu.memory_space<vmem>>, %arg3: memref<8x1xf32, #tpu.memory_space<vmem>>, %arg4: memref<8x1xf32, #tpu.memory_space<vmem>>, %arg5: memref<1x8x64xf32, #tpu.memory_space<vmem>>) attributes {dimension_semantics = [#tpu.dimension_semantics<parallel>, #tpu.dimension_semantics<parallel>], iteration_bounds = array<i64: 2, 1>, scalar_prefetch = 0 : i64, scratch_operands = 0 : i64, tpu.core_type = #tpu.core_type<tc>, window_params = [{transform_indices = @transform_0, window_bounds = array<i64: 1, 8, 64>}, {pipeline_mode = #tpu.pipeline_mode<synchronous>, transform_indices = @transform_1, window_bounds = array<i64: 8, 1>}, {pipeline_mode = #tpu.pipeline_mode<synchronous>, transform_indices = @transform_2, window_bounds = array<i64: 8, 1>}, {transform_indices = @transform_3, window_bounds = array<i64: 1, 8, 64>}]} {
    %c0 = arith.constant 0 : index
    %c0_0 = arith.constant 0 : index
    %c0_1 = arith.constant 0 : index
    %0 = vector.load %arg2[%c0, %c0_0, %c0_1] : memref<1x8x64xf32, #tpu.memory_space<vmem>>, vector<1x8x64xf32>
    %1 = vector.shape_cast %0 : vector<1x8x64xf32> to vector<8x64xf32>
    %c0_2 = arith.constant 0 : index
    %c0_3 = arith.constant 0 : index
    %2 = vector.load %arg3[%c0_2, %c0_3] : memref<8x1xf32, #tpu.memory_space<vmem>>, vector<8x1xf32>
    %3 = vector.broadcast %2 : vector<8x1xf32> to vector<8x64xf32>
    %4 = arith.mulf %1, %3 : vector<8x64xf32>
    %c0_4 = arith.constant 0 : index
    %c0_5 = arith.constant 0 : index
    %5 = vector.load %arg4[%c0_4, %c0_5] : memref<8x1xf32, #tpu.memory_space<vmem>>, vector<8x1xf32>
    %6 = vector.broadcast %5 : vector<8x1xf32> to vector<8x64xf32>
    %7 = arith.addf %4, %6 : vector<8x64xf32>
    %cst = arith.constant 0.000000e+00 : f32
    %8 = vector.broadcast %cst : f32 to vector<8x64xf32>
    %9 = arith.maximumf %7, %8 : vector<8x64xf32>
    %c0_6 = arith.constant 0 : index
    %c0_7 = arith.constant 0 : index
    %c0_8 = arith.constant 0 : index
    %10 = vector.load %arg5[%c0_6, %c0_7, %c0_8] : memref<1x8x64xf32, #tpu.memory_space<vmem>>, vector<1x8x64xf32>
    %11 = vector.shape_cast %10 : vector<1x8x64xf32> to vector<8x64xf32>
    %12 = vector.shape_cast %9 : vector<8x64xf32> to vector<1x8x64xf32>
    tpu.vector_store %arg5[%c0_6, %c0_7, %c0_8], %12 {strides = array<i32>} : memref<1x8x64xf32, #tpu.memory_space<vmem>>, vector<1x8x64xf32>,
    return
  }
  func.func @transform_0(%arg0: i32, %arg1: i32) -> (i32, i32, i32) {
    %c0_i32 = arith.constant 0 : i32
    %c0_i32_0 = arith.constant 0 : i32
    return %arg0, %c0_i32, %arg1 : i32, i32, i32
  }
  func.func @transform_1(%arg0: i32, %arg1: i32) -> (i32, i32) {
    %c0_i32 = arith.constant 0 : i32
    %c0_i32_0 = arith.constant 0 : i32
    %c0_i32_1 = arith.constant 0 : i32
    return %c0_i32, %c0_i32_0 : i32, i32
  }
  func.func @transform_2(%arg0: i32, %arg1: i32) -> (i32, i32) {
    %c0_i32 = arith.constant 0 : i32
    %c0_i32_0 = arith.constant 0 : i32
    %c0_i32_1 = arith.constant 0 : i32
    return %c0_i32, %c0_i32_0 : i32, i32
  }
  func.func @transform_3(%arg0: i32, %arg1: i32) -> (i32, i32, i32) {
    %c0_i32 = arith.constant 0 : i32
    %c0_i32_0 = arith.constant 0 : i32
    return %arg0, %c0_i32, %arg1 : i32, i32, i32
  }
}

</mosaic_0001>

<bundles_post_ra>
// kernel: conv_block_forward.2
= control target key start
LH: loop header
LB: loop body
LE: loop exit
PB: predicated region body
PF: predicated region fallthrough
CT: control target
= control target key end

     0   :  { %s459_s12 = smov 0   ;;  %s461_s13 = smov 0   ;;  %s505_s0 = inlined_call_operand.vmem [shape: f32[2,36,64], index: 0, kind: input, shape index: {}]   ;;  %s506_s1 = inlined_call_operand.vmem [shape: f32[8,36], index: 1, kind: input, shape index: {}]   ;;  %s507_s2 = inlined_call_operand.vmem [shape: f32[2,8,64], index: 2, kind: output, shape index: {0}]   ;;  %s508_s3 = inlined_call_operand.vmem [shape: f32[2,8,2], index: 3, kind: output, shape index: {1}]  }
   0x1   :  { %s463_s14 = smov 0  }
   0x2 LB: > { %s26_s15 = sadd.s32 1, %s432_s13  ;;  %p380_p0 = scmp.ge.s32.totalorder %s436_s14, 1  ;;  %s436_s14 = sphi %s463_s14, %s14_s14   ;;  %s432_s13 = sphi %s461_s13, %s510_s13   ;;  %s428_s12 = sphi %s459_s12, %s509_s12  }
   0x3   : > { %p28_p1 = scmp.ge.s32.totalorder %s26_s15, 2  ;;  %p159_p2 = scmp.lt.s32.totalorder %s436_s14, 3 }
   0x5   : > { %s512_s15 = smov (%p28_p1, %s26_s15), 0  ;;  %p160_p3 = pnand %p380_p0, %p159_p2 }
   0x6   : > { %p192_p4 = scmp.lt.s32.totalorder (!%p160_p3), %s428_s12, 1 }
   0x7   : > { %163 = sbr.rel (%p160_p3) target bundleno = 282 (0x11a), region = 28 }
   0xc   : > { %s514_s12 = smov (!%p192_p4, %s428_s12), 1  ;;  %vm215_vm0 = vcmask 15360   ;;  %vm227_vm1 = vcmask 1043456   ;;  %v438_v0 = vmov 0.0   ;;  %v217_v6 = vld [vmem:[%s506_s1] sm:$0xff]  ;;  %vm223_vm2 = vcmask 293888  }
   0xd   : > { %s388_s16 = smul.u32 40, %s514_s12  ;;  %s382_s17 = sshll.u32 %s514_s12, 3  ;;  %vm251_vm3 = vcmask 523264   ;;  %vm258_vm4 = vcmask 7168   ;;  %vm266_vm5 = vcmask 15368  }
   0xe   : > { %s480_s20 = scalar_lea.vmem %s508_s3, %s382_s17  ;;  %s206_s28 = scalar_lea.vmem %s507_s2, %s382_s17 }
   0xf   : > { %s199_s23 = scalar_lea.vmem %s505_s0, %s388_s16  ;;  %216 = vst.msk [vmem:[%s480_s20] sm:$0xff] %vm215_vm0, %v438_v0 }
  0x10   : > { %v222_v1 = vld [vmem:[%s199_s23 + $0x20] sm:$0xf]  ;;  %v221_v2 = vld [vmem:[%s199_s23 + $0x18] sm:$0xff]  ;;  %v220_v3 = vld [vmem:[%s199_s23 + $0x10] sm:$0xff] }
  0x11   : > { %384 = vmatpush.msk.msra.mxu0 %vm227_vm1, %v222_v1  ;;  %v219_v4 = vld [vmem:[%s199_s23 + $0x8] sm:$0xff]  ;;  %v218_v5 = vld [vmem:[%s199_s23] sm:$0xff] }
  0x13   : > { %243 = vmatpush.msra.mxu0 %v221_v2 }
  0x15   : > { %244 = vmatpush.msra.mxu0 %v220_v3 }
  0x16   : > { %v253_v11 = vld [vmem:[%s480_s20] sm:$0xff] }
  0x17   : > { %245 = vmatpush.msra.mxu0 %v219_v4 }
  0x19   : > { %246 = vmatpush.msra.mxu0 %v218_v5 }
  0x1a   : > { %385 = vmatmul.msk.f32.vlgmr.msra.gmra.mxu0 %vm223_vm2, %v217_v6 }
  0x97   : > { %v248_v7 = vpop.f32.mrf.mxu0 }
  0x98   : > { %252 = vst.msk [vmem:[%s206_s28] sm:$0xff] %vm251_vm3, %v248_v7  ;;  %v254_v8 = vsel %vm251_vm3, %v248_v7, 0.0  ;;  %v261_v9 = vmul.f32 %v248_v7, %v248_v7 }
  0x99   : > { %255 = vadd.xlane.f32.xlu0 %v254_v8 }
  0x9a   : > { %v262_v10 = vsel %vm251_vm3, %v261_v9, 0.0 }
  0xa1   : > { %263 = vadd.xlane.f32.xlu0 %v262_v10 }
 0x10c   : > { %v256_v12 = vpop.xlane.xlu0 %255 }
 0x10d   : > { %v257_v13 = vadd.f32 %v256_v12, %v253_v11 }
 0x10f   : > { %259 = vst.msk [vmem:[%s480_s20] sm:$0xff] %vm258_vm4, %v257_v13 }
 0x114   : > { %v264_v15 = vpop.xlane.xlu0 %263 }
 0x116   : > { %v260_v14 = vld [vmem:[%s480_s20] sm:$0xff] }
 0x117   : > { %v265_v16 = vadd.f32 %v264_v15, %v260_v14 }
 0x119   : > { %267 = vst.msk [vmem:[%s480_s20] sm:$0xff] %vm266_vm5, %v265_v16 }
 0x11a PF: > { %s14_s14 = sadd.s32 1, %s436_s14   ;;  %s509_s12 = smov %s432_s13 }
 0x11b   : > { %p11_p5 = scmp.ge.s32.totalorder %s14_s14, 4   ;;  %s510_s13 = smov %s512_s15 }
 0x11d   :  { %13 = sbr.rel (!%p11_p5) target bundleno = 2 (0x2), region = 74 }

// kernel: conv_block_forward.3
= control target key start
LH: loop header
LB: loop body
LE: loop exit
PB: predicated region body
PF: predicated region fallthrough
CT: control target
= control target key end

     0   :  { %s369_s12 = smov 0   ;;  %s371_s13 = smov 0   ;;  %s405_s0 = inlined_call_operand.vmem [shape: f32[2,8,64], index: 0, kind: input, shape index: {}, may-alias: {0,3}]   ;;  %s406_s1 = inlined_call_operand.vmem [shape: f32[8,1], index: 1, kind: input, shape index: {}]   ;;  %s407_s2 = inlined_call_operand.vmem [shape: f32[8,1], index: 2, kind: input, shape index: {}]   ;;  %s408_s3 = inlined_call_operand.vmem [shape: f32[2,8,64], index: 3, kind: output, shape index: {}, may-alias: {0,3}]  }
   0x1   :  { %s373_s14 = smov 0  }
   0x2 LB: > { %s25_s15 = sadd.s32 1, %s342_s13  ;;  %p293_p0 = scmp.ge.s32.totalorder %s346_s14, 1  ;;  %s346_s14 = sphi %s373_s14, %s13_s14   ;;  %s342_s13 = sphi %s371_s13, %s410_s13   ;;  %s338_s12 = sphi %s369_s12, %s409_s12  }
   0x3   : > { %p27_p1 = scmp.ge.s32.totalorder %s25_s15, 2  ;;  %p155_p2 = scmp.lt.s32.totalorder %s346_s14, 3 }
   0x5   : > { %s412_s15 = smov (%p27_p1, %s25_s15), 0  ;;  %p156_p3 = pnand %p293_p0, %p155_p2 }
   0x6   : > { %p183_p4 = scmp.lt.s32.totalorder (!%p156_p3), %s338_s12, 1 }
   0x7   : > { %159 = sbr.rel (%p156_p3) target bundleno = 142 (0x8e), region = 32 }
   0xc   : > { %v198_v0 = vld [vmem:[%s406_s1] sm:$0xff]  ;;  %v348_v1 = vmov 0   ;;  %s414_s12 = smov (!%p183_p4, %s338_s12), 1  ;;  %vm213_vm0 = vcmask 523264  }
   0xd   : > { %323 = vset.pattern.permute.xlu0 %v348_v1  ;;  %v205_v2 = vld [vmem:[%s407_s2] sm:$0xff]  ;;  %s294_s20 = sshll.u32 %s414_s12, 3 }
   0xe   : > { %201 = vperm.xlu0 %323, %v198_v0   ;;  %s189_s23 = scalar_lea.vmem %s405_s0, %s294_s20  ;;  %s196_s26 = scalar_lea.vmem %s408_s3, %s294_s20 }
   0xf   : > { %v197_v4 = vld [vmem:[%s189_s23] sm:$0xff] }
  0x16   : > { %208 = vperm.xlu0 %323, %v205_v2  }
  0x80   : > { %v202_v3 = vpop.permute.xlu0 %201 }
  0x81   : > { %v204_v5 = vmul.f32 %v202_v3, %v197_v4 }
  0x88   : > { %v209_v6 = vpop.permute.xlu0 %208 }
  0x89   : > { %v211_v7 = vadd.f32 %v209_v6, %v204_v5 }
  0x8b   : > { %v212_v8 = vmax.f32 %v211_v7, 0.0 }
  0x8d   : > { %214 = vst.msk [vmem:[%s196_s26] sm:$0xff] %vm213_vm0, %v212_v8 }
  0x8e PF: > { %s13_s14 = sadd.s32 1, %s346_s14   ;;  %s409_s12 = smov %s342_s13 }
  0x8f   : > { %p10_p5 = scmp.ge.s32.totalorder %s13_s14, 4   ;;  %s410_s13 = smov %s412_s15 }
  0x91   :  { %12 = sbr.rel (!%p10_p5) target bundleno = 2 (0x2), region = 62 }

</bundles_post_ra>
